<compile_context>
chip_gen: v5e
topology: v5e:2x2
jax: 0.10.0
libtpu: 0.0.40
codegen_flags: <defaults>
</compile_context>

<pallas_src>
import functools
import math

import jax
import jax.numpy as jnp
from jax.experimental import pallas as pl
from jax.experimental.pallas import tpu as pltpu

LN_EPS = 1e-5


def _layernorm(x, gamma, beta):
    """LayerNorm over the last axis. gamma/beta broadcast as (1, D)."""
    mu = jnp.mean(x, axis=-1, keepdims=True)
    var = jnp.mean(jnp.square(x - mu), axis=-1, keepdims=True)
    return (x - mu) * jax.lax.rsqrt(var + LN_EPS) * gamma + beta


# --------------------------------------------------------------------------
# Fused EncoderBlock kernel: LN -> MHA(+rel-pos bias) -> +res -> LN -> GCNMlp -> +res
# --------------------------------------------------------------------------
def _encoder_block_kernel(
    x_ref, rpb_ref, adj_ref,
    ln1_g_ref, ln1_b_ref,
    wk_ref, bk_ref, wv_ref, bv_ref, wq_ref, bq_ref,
    wp_ref, bp_ref,
    ln2_g_ref, ln2_b_ref,
    wfc1_ref, bfc1_ref, wgcn_ref, bgcn_ref, wfc2_ref, bfc2_ref,
    o_ref,
    *, n_head: int,
):
    x = x_ref[0]            # (S, D)
    rpb = rpb_ref[0]        # (H, S, S)
    adj = adj_ref[0]        # (S, S)
    D = x.shape[-1]
    dk = D // n_head
    scale = 1.0 / math.sqrt(dk)

    # ---------------- Self-attention block ----------------
    xn = _layernorm(x, ln1_g_ref[...], ln1_b_ref[...])
    q = jnp.dot(xn, wq_ref[...], preferred_element_type=jnp.float32) + bq_ref[...]
    k = jnp.dot(xn, wk_ref[...], preferred_element_type=jnp.float32) + bk_ref[...]
    v = jnp.dot(xn, wv_ref[...], preferred_element_type=jnp.float32) + bv_ref[...]

    heads = []
    for h in range(n_head):                       # static unroll, n_head small
        sl = slice(h * dk, (h + 1) * dk)
        qh, kh, vh = q[:, sl], k[:, sl], v[:, sl]
        # q @ k^T via contracting the feature dims (no explicit transpose)
        s = jax.lax.dot_general(
            qh, kh, (((1,), (1,)), ((), ())),
            preferred_element_type=jnp.float32) * scale
        s = s * (1.0 + rpb[h])
        # softmax over the key axis
        s = s - jnp.max(s, axis=-1, keepdims=True)
        e = jnp.exp(s)
        p = e / jnp.sum(e, axis=-1, keepdims=True)
        heads.append(jnp.dot(p, vh, preferred_element_type=jnp.float32))
    attn = jnp.concatenate(heads, axis=-1)        # (S, D)
    attn = jnp.dot(attn, wp_ref[...], preferred_element_type=jnp.float32) + bp_ref[...]
    x = x + attn                                  # residual (DropPath = identity)

    # ---------------- GCN feed-forward block ----------------
    xn2 = _layernorm(x, ln2_g_ref[...], ln2_b_ref[...])
    x1 = jnp.dot(xn2, wfc1_ref[...], preferred_element_type=jnp.float32) + bfc1_ref[...]
    g = jnp.dot(xn2, wgcn_ref[...], preferred_element_type=jnp.float32) + bgcn_ref[...]
    hm = g.shape[-1]
    g1 = g[:, : hm // 2]
    g2 = g[:, hm // 2:]
    gc1 = jnp.dot(adj, g1, preferred_element_type=jnp.float32)
    # adj.mT @ g2 == contract adj dim 0 with g2 dim 0 (no explicit transpose)
    gc2 = jax.lax.dot_general(
        adj, g2, (((0,), (0,)), ((), ())), preferred_element_type=jnp.float32)
    ff = x1 + jnp.concatenate([gc1, gc2], axis=-1)
    ff = jnp.maximum(ff, 0.0)                     # act_layer='relu'
    ff = jnp.dot(ff, wfc2_ref[...], preferred_element_type=jnp.float32) + bfc2_ref[...]

    o_ref[0] = (x + ff).astype(o_ref.dtype)


def _encoder_block_call(x, rel_pos_bias, adj, p, *, n_head):
    B, S, D = x.shape
    H = n_head
    Hm = p["w_fc1"].shape[1]

    def full(shape):
        n = len(shape)
        return pl.BlockSpec(shape, lambda b, _n=n: (0,) * _n)

    in_specs = [
        pl.BlockSpec((1, S, D), lambda b: (b, 0, 0)),        # x  (per-batch slab)
        pl.BlockSpec((1, H, S, S), lambda b: (b, 0, 0, 0)),  # rel-pos bias
        pl.BlockSpec((1, S, S), lambda b: (b, 0, 0)),        # adj
        full((1, D)), full((1, D)),                          # ln1 gamma/beta
        full((D, D)), full((1, D)),                          # Wk, bk
        full((D, D)), full((1, D)),                          # Wv, bv
        full((D, D)), full((1, D)),                          # Wq, bq
        full((D, D)), full((1, D)),                          # Wproj, bproj
        full((1, D)), full((1, D)),                          # ln2 gamma/beta
        full((D, Hm)), full((1, Hm)),                        # fc1
        full((D, Hm)), full((1, Hm)),                        # gcn
        full((Hm, D)), full((1, D)),                         # fc2
    ]
    args = (
        x, rel_pos_bias, adj,
        p["ln1_g"], p["ln1_b"],
        p["w_k"], p["b_k"], p["w_v"], p["b_v"], p["w_q"], p["b_q"],
        p["w_proj"], p["b_proj"],
        p["ln2_g"], p["ln2_b"],
        p["w_fc1"], p["b_fc1"], p["w_gcn"], p["b_gcn"], p["w_fc2"], p["b_fc2"],
    )
    kernel = functools.partial(_encoder_block_kernel, n_head=n_head)
    return pl.pallas_call(
        kernel,
        out_shape=jax.ShapeDtypeStruct((B, S, D), x.dtype),
        grid_spec=pltpu.PrefetchScalarGridSpec(
            num_scalar_prefetch=0,
            grid=(B,),
            in_specs=in_specs,
            out_specs=pl.BlockSpec((1, S, D), lambda b: (b, 0, 0)),
        ),
        compiler_params=pltpu.CompilerParams(
            dimension_semantics=("parallel",)),
    )(*args)


# --------------------------------------------------------------------------
# Final LayerNorm kernel
# --------------------------------------------------------------------------
def _final_ln_kernel(x_ref, g_ref, b_ref, o_ref):
    o_ref[0] = _layernorm(x_ref[0], g_ref[...], b_ref[...]).astype(o_ref.dtype)


def _final_ln_call(x, gamma, beta):
    B, S, D = x.shape
    return pl.pallas_call(
        _final_ln_kernel,
        out_shape=jax.ShapeDtypeStruct((B, S, D), x.dtype),
        grid_spec=pltpu.PrefetchScalarGridSpec(
            num_scalar_prefetch=0,
            grid=(B,),
            in_specs=[
                pl.BlockSpec((1, S, D), lambda b: (b, 0, 0)),
                pl.BlockSpec((1, D), lambda b: (0, 0)),
                pl.BlockSpec((1, D), lambda b: (0, 0)),
            ],
            out_specs=pl.BlockSpec((1, S, D), lambda b: (b, 0, 0)),
        ),
        compiler_params=pltpu.CompilerParams(
            dimension_semantics=("parallel",)),
    )(x, gamma, beta)


# --------------------------------------------------------------------------
# Encoder forward (Python loop over layers; each layer = one fused kernel)
# --------------------------------------------------------------------------
def encoder_forward(x, rel_pos, adj, layer_params, final_ln, *, n_head):
    rel_pos_t = jnp.swapaxes(rel_pos, -1, -2)
    for p in layer_params:
        # TODO(synk): embedding gather kept in the wrapper (tiny, data-dependent).
        rpb = p["emb_fwd"][rel_pos] + p["emb_bwd"][rel_pos_t]        # (B,S,S,H)
        rpb = jnp.transpose(rpb, (0, 3, 1, 2)).astype(x.dtype)       # (B,H,S,S)
        x = _encoder_block_call(x, rpb, adj, p, n_head=n_head)
    return _final_ln_call(x, final_ln["g"], final_ln["b"])


# --------------------------------------------------------------------------
# Pure-JAX reference (mirrors the PyTorch module, eval mode)
# --------------------------------------------------------------------------
def _reference_encoder(x, rel_pos, adj, layer_params, final_ln, *, n_head):
    B, S, D = x.shape
    dk = D // n_head
    rel_pos_t = jnp.swapaxes(rel_pos, -1, -2)
    for p in layer_params:
        xn = _layernorm(x, p["ln1_g"], p["ln1_b"])
        q = xn @ p["w_q"] + p["b_q"]
        k = xn @ p["w_k"] + p["b_k"]
        v = xn @ p["w_v"] + p["b_v"]

        def split(t):
            return jnp.transpose(t.reshape(B, S, n_head, dk), (0, 2, 1, 3))

        qh, kh, vh = split(q), split(k), split(v)
        attn = jnp.einsum("bhqd,bhkd->bhqk", qh, kh) / math.sqrt(dk)
        rpb = p["emb_fwd"][rel_pos] + p["emb_bwd"][rel_pos_t]
        rpb = jnp.transpose(rpb, (0, 3, 1, 2))
        attn = attn * (1.0 + rpb)
        attn = jax.nn.softmax(attn, axis=-1)
        out = jnp.einsum("bhqk,bhkd->bhqd", attn, vh)
        out = jnp.transpose(out, (0, 2, 1, 3)).reshape(B, S, D)
        x = x + (out @ p["w_proj"] + p["b_proj"])

        xn2 = _layernorm(x, p["ln2_g"], p["ln2_b"])
        x1 = xn2 @ p["w_fc1"] + p["b_fc1"]
        g = xn2 @ p["w_gcn"] + p["b_gcn"]
        hm = g.shape[-1]
        g1, g2 = g[..., : hm // 2], g[..., hm // 2:]
        gc1 = jnp.einsum("bij,bjk->bik", adj, g1)
        gc2 = jnp.einsum("bji,bjk->bik", adj, g2)   # adj.mT @ g2
        ff = jax.nn.relu(x1 + jnp.concatenate([gc1, gc2], axis=-1))
        x = x + (ff @ p["w_fc2"] + p["b_fc2"])
    return _layernorm(x, final_ln["g"], final_ln["b"])


# --------------------------------------------------------------------------
# Deterministic synthetic parameters (linear weights stored as (in, out))
# --------------------------------------------------------------------------
def _init_params(key, depth, dim, n_head, hidden):
    keys = iter(jax.random.split(key, depth * 24 + 8))

    def uni(fan_in, shape):
        b = 1.0 / math.sqrt(fan_in)
        return jax.random.uniform(next(keys), shape, minval=-b, maxval=b,
                                  dtype=jnp.float32)

    def ln_pair():
        g = 1.0 + 0.1 * jax.random.normal(next(keys), (1, dim), dtype=jnp.float32)
        b = 0.1 * jax.random.normal(next(keys), (1, dim), dtype=jnp.float32)
        return g, b

    def emb():
        e = jax.random.normal(next(keys), (10, n_head), dtype=jnp.float32)
        return e.at[9].set(0.0)   # padding_idx = 9

    layers = []
    for _ in range(depth):
        ln1_g, ln1_b = ln_pair()
        ln2_g, ln2_b = ln_pair()
        layers.append({
            "ln1_g": ln1_g, "ln1_b": ln1_b,
            "w_k": uni(dim, (dim, dim)), "b_k": uni(dim, (1, dim)),
            "w_v": uni(dim, (dim, dim)), "b_v": uni(dim, (1, dim)),
            "w_q": uni(dim, (dim, dim)), "b_q": uni(dim, (1, dim)),
            "w_proj": uni(dim, (dim, dim)), "b_proj": uni(dim, (1, dim)),
            "ln2_g": ln2_g, "ln2_b": ln2_b,
            "w_fc1": uni(dim, (dim, hidden)), "b_fc1": uni(dim, (1, hidden)),
            "w_gcn": uni(dim, (dim, hidden)), "b_gcn": uni(dim, (1, hidden)),
            "w_fc2": uni(hidden, (hidden, dim)), "b_fc2": uni(hidden, (1, dim)),
            "emb_fwd": emb(), "emb_bwd": emb(),
        })
    final_ln = dict(zip(("g", "b"), ln_pair()))
    return layers, final_ln


if __name__ == "__main__":
    key = jax.random.PRNGKey(0)
    B, S, DIM, N_HEAD, DEPTH = 2, 8, 32, 2, 2
    HIDDEN = int(4.0 * DIM)   # mlp_ratio = 4.0

    k_params, k_x, k_rp, k_adj = jax.random.split(key, 4)
    layer_params, final_ln = _init_params(k_params, DEPTH, DIM, N_HEAD, HIDDEN)
    x = jax.random.normal(k_x, (B, S, DIM), dtype=jnp.float32)
    rel_pos = jax.random.randint(k_rp, (B, S, S), 0, 10)
    adj = (jax.random.uniform(k_adj, (B, S, S)) < 0.3).astype(jnp.float32)

    out = encoder_forward(x, rel_pos, adj, layer_params, final_ln, n_head=N_HEAD)
    out = jax.block_until_ready(out)
    ref = _reference_encoder(x, rel_pos, adj, layer_params, final_ln,
                             n_head=N_HEAD)

    if out.shape == ref.shape and bool(jnp.allclose(out, ref, atol=1e-3, rtol=1e-3)):
        print("KERNEL_OK")
    else:
        print("KERNEL_MISMATCH")
</pallas_src>

<mosaic_0001>
module attributes {stable_mosaic.version = 11 : i64} {
  func.func @_encoder_block_kernel(%arg0: i32, %arg1: memref<1x8x32xf32, #tpu.memory_space<vmem>>, %arg2: memref<1x2x8x8xf32, #tpu.memory_space<vmem>>, %arg3: memref<1x8x8xf32, #tpu.memory_space<vmem>>, %arg4: memref<1x32xf32, #tpu.memory_space<vmem>>, %arg5: memref<1x32xf32, #tpu.memory_space<vmem>>, %arg6: memref<32x32xf32, #tpu.memory_space<vmem>>, %arg7: memref<1x32xf32, #tpu.memory_space<vmem>>, %arg8: memref<32x32xf32, #tpu.memory_space<vmem>>, %arg9: memref<1x32xf32, #tpu.memory_space<vmem>>, %arg10: memref<32x32xf32, #tpu.memory_space<vmem>>, %arg11: memref<1x32xf32, #tpu.memory_space<vmem>>, %arg12: memref<32x32xf32, #tpu.memory_space<vmem>>, %arg13: memref<1x32xf32, #tpu.memory_space<vmem>>, %arg14: memref<1x32xf32, #tpu.memory_space<vmem>>, %arg15: memref<1x32xf32, #tpu.memory_space<vmem>>, %arg16: memref<32x128xf32, #tpu.memory_space<vmem>>, %arg17: memref<1x128xf32, #tpu.memory_space<vmem>>, %arg18: memref<32x128xf32, #tpu.memory_space<vmem>>, %arg19: memref<1x128xf32, #tpu.memory_space<vmem>>, %arg20: memref<128x32xf32, #tpu.memory_space<vmem>>, %arg21: memref<1x32xf32, #tpu.memory_space<vmem>>, %arg22: memref<1x8x32xf32, #tpu.memory_space<vmem>>) attributes {dimension_semantics = [#tpu.dimension_semantics<parallel>], iteration_bounds = array<i64: 2>, scalar_prefetch = 0 : i64, scratch_operands = 0 : i64, tpu.core_type = #tpu.core_type<tc>, window_params = [{transform_indices = @transform_0, window_bounds = array<i64: 1, 8, 32>}, {transform_indices = @transform_1, window_bounds = array<i64: 1, 2, 8, 8>}, {transform_indices = @transform_2, window_bounds = array<i64: 1, 8, 8>}, {pipeline_mode = #tpu.pipeline_mode<synchronous>, transform_indices = @transform_3, window_bounds = array<i64: 1, 32>}, {pipeline_mode = #tpu.pipeline_mode<synchronous>, transform_indices = @transform_4, window_bounds = array<i64: 1, 32>}, {pipeline_mode = #tpu.pipeline_mode<synchronous>, transform_indices = @transform_5, window_bounds = array<i64: 32, 32>}, {pipeline_mode = #tpu.pipeline_mode<synchronous>, transform_indices = @transform_6, window_bounds = array<i64: 1, 32>}, {pipeline_mode = #tpu.pipeline_mode<synchronous>, transform_indices = @transform_7, window_bounds = array<i64: 32, 32>}, {pipeline_mode = #tpu.pipeline_mode<synchronous>, transform_indices = @transform_8, window_bounds = array<i64: 1, 32>}, {pipeline_mode = #tpu.pipeline_mode<synchronous>, transform_indices = @transform_9, window_bounds = array<i64: 32, 32>}, {pipeline_mode = #tpu.pipeline_mode<synchronous>, transform_indices = @transform_10, window_bounds = array<i64: 1, 32>}, {pipeline_mode = #tpu.pipeline_mode<synchronous>, transform_indices = @transform_11, window_bounds = array<i64: 32, 32>}, {pipeline_mode = #tpu.pipeline_mode<synchronous>, transform_indices = @transform_12, window_bounds = array<i64: 1, 32>}, {pipeline_mode = #tpu.pipeline_mode<synchronous>, transform_indices = @transform_13, window_bounds = array<i64: 1, 32>}, {pipeline_mode = #tpu.pipeline_mode<synchronous>, transform_indices = @transform_14, window_bounds = array<i64: 1, 32>}, {pipeline_mode = #tpu.pipeline_mode<synchronous>, transform_indices = @transform_15, window_bounds = array<i64: 32, 128>}, {pipeline_mode = #tpu.pipeline_mode<synchronous>, transform_indices = @transform_16, window_bounds = array<i64: 1, 128>}, {pipeline_mode = #tpu.pipeline_mode<synchronous>, transform_indices = @transform_17, window_bounds = array<i64: 32, 128>}, {pipeline_mode = #tpu.pipeline_mode<synchronous>, transform_indices = @transform_18, window_bounds = array<i64: 1, 128>}, {pipeline_mode = #tpu.pipeline_mode<synchronous>, transform_indices = @transform_19, window_bounds = array<i64: 128, 32>}, {pipeline_mode = #tpu.pipeline_mode<synchronous>, transform_indices = @transform_20, window_bounds = array<i64: 1, 32>}, {transform_indices = @transform_21, window_bounds = array<i64: 1, 8, 32>}]} {
    %c0 = arith.constant 0 : index
    %c0_0 = arith.constant 0 : index
    %c0_1 = arith.constant 0 : index
    %0 = vector.load %arg1[%c0, %c0_0, %c0_1] : memref<1x8x32xf32, #tpu.memory_space<vmem>>, vector<1x8x32xf32>
    %1 = vector.shape_cast %0 : vector<1x8x32xf32> to vector<8x32xf32>
    %c0_2 = arith.constant 0 : index
    %c0_3 = arith.constant 0 : index
    %c0_4 = arith.constant 0 : index
    %c0_5 = arith.constant 0 : index
    %2 = vector.load %arg2[%c0_2, %c0_3, %c0_4, %c0_5] : memref<1x2x8x8xf32, #tpu.memory_space<vmem>>, vector<1x2x8x8xf32>
    %3 = vector.shape_cast %2 : vector<1x2x8x8xf32> to vector<2x8x8xf32>
    %c0_6 = arith.constant 0 : index
    %c0_7 = arith.constant 0 : index
    %c0_8 = arith.constant 0 : index
    %4 = vector.load %arg3[%c0_6, %c0_7, %c0_8] : memref<1x8x8xf32, #tpu.memory_space<vmem>>, vector<1x8x8xf32>
    %5 = vector.shape_cast %4 : vector<1x8x8xf32> to vector<8x8xf32>
    %c0_9 = arith.constant 0 : index
    %c0_10 = arith.constant 0 : index
    %6 = vector.load %arg4[%c0_9, %c0_10] : memref<1x32xf32, #tpu.memory_space<vmem>>, vector<1x32xf32>
    %c0_11 = arith.constant 0 : index
    %c0_12 = arith.constant 0 : index
    %7 = vector.load %arg5[%c0_11, %c0_12] : memref<1x32xf32, #tpu.memory_space<vmem>>, vector<1x32xf32>
    %cst = arith.constant dense<0.000000e+00> : vector<8xf32>
    %8 = vector.multi_reduction <add>, %1, %cst [1] : vector<8x32xf32> to vector<8xf32>
    %9 = vector.shape_cast %8 : vector<8xf32> to vector<8x1xf32>
    %cst_13 = arith.constant 3.200000e+01 : f32
    %10 = vector.broadcast %cst_13 : f32 to vector<8x1xf32>
    %11 = arith.divf %9, %10 : vector<8x1xf32>
    %12 = vector.broadcast %11 : vector<8x1xf32> to vector<8x32xf32>
    %13 = arith.subf %1, %12 : vector<8x32xf32>
    %14 = arith.mulf %13, %13 : vector<8x32xf32>
    %cst_14 = arith.constant dense<0.000000e+00> : vector<8xf32>
    %15 = vector.multi_reduction <add>, %14, %cst_14 [1] : vector<8x32xf32> to vector<8xf32>
    %16 = vector.shape_cast %15 : vector<8xf32> to vector<8x1xf32>
    %cst_15 = arith.constant 3.200000e+01 : f32
    %17 = vector.broadcast %cst_15 : f32 to vector<8x1xf32>
    %18 = arith.divf %16, %17 : vector<8x1xf32>
    %19 = vector.broadcast %11 : vector<8x1xf32> to vector<8x32xf32>
    %20 = arith.subf %1, %19 : vector<8x32xf32>
    %cst_16 = arith.constant 9.99999974E-6 : f32
    %21 = vector.broadcast %cst_16 : f32 to vector<8x1xf32>
    %22 = arith.addf %18, %21 : vector<8x1xf32>
    %23 = math.rsqrt %22 : vector<8x1xf32>
    %24 = vector.broadcast %23 : vector<8x1xf32> to vector<8x32xf32>
    %25 = arith.mulf %20, %24 : vector<8x32xf32>
    %26 = vector.broadcast %6 : vector<1x32xf32> to vector<8x32xf32>
    %27 = arith.mulf %25, %26 : vector<8x32xf32>
    %28 = vector.broadcast %7 : vector<1x32xf32> to vector<8x32xf32>
    %29 = arith.addf %27, %28 : vector<8x32xf32>
    %c0_17 = arith.constant 0 : index
    %c0_18 = arith.constant 0 : index
    %30 = vector.load %arg10[%c0_17, %c0_18] : memref<32x32xf32, #tpu.memory_space<vmem>>, vector<32x32xf32>
    %cst_19 = arith.constant dense<0.000000e+00> : vector<8x32xf32>
    %31 = tpu.matmul %29, %30, %cst_19 {dimension_numbers = #tpu.dot_dimension_numbers<[1], [0], [0], [1], [0, 0, 1, 1], [], []>} : vector<8x32xf32>, vector<32x32xf32>, vector<8x32xf32> -> vector<8x32xf32>
    %c0_20 = arith.constant 0 : index
    %c0_21 = arith.constant 0 : index
    %32 = vector.load %arg11[%c0_20, %c0_21] : memref<1x32xf32, #tpu.memory_space<vmem>>, vector<1x32xf32>
    %33 = vector.broadcast %32 : vector<1x32xf32> to vector<8x32xf32>
    %34 = arith.addf %31, %33 : vector<8x32xf32>
    %c0_22 = arith.constant 0 : index
    %c0_23 = arith.constant 0 : index
    %35 = vector.load %arg6[%c0_22, %c0_23] : memref<32x32xf32, #tpu.memory_space<vmem>>, vector<32x32xf32>
    %cst_24 = arith.constant dense<0.000000e+00> : vector<8x32xf32>
    %36 = tpu.matmul %29, %35, %cst_24 {dimension_numbers = #tpu.dot_dimension_numbers<[1], [0], [0], [1], [0, 0, 1, 1], [], []>} : vector<8x32xf32>, vector<32x32xf32>, vector<8x32xf32> -> vector<8x32xf32>
    %c0_25 = arith.constant 0 : index
    %c0_26 = arith.constant 0 : index
    %37 = vector.load %arg7[%c0_25, %c0_26] : memref<1x32xf32, #tpu.memory_space<vmem>>, vector<1x32xf32>
    %38 = vector.broadcast %37 : vector<1x32xf32> to vector<8x32xf32>
    %39 = arith.addf %36, %38 : vector<8x32xf32>
    %c0_27 = arith.constant 0 : index
    %c0_28 = arith.constant 0 : index
    %40 = vector.load %arg8[%c0_27, %c0_28] : memref<32x32xf32, #tpu.memory_space<vmem>>, vector<32x32xf32>
    %cst_29 = arith.constant dense<0.000000e+00> : vector<8x32xf32>
    %41 = tpu.matmul %29, %40, %cst_29 {dimension_numbers = #tpu.dot_dimension_numbers<[1], [0], [0], [1], [0, 0, 1, 1], [], []>} : vector<8x32xf32>, vector<32x32xf32>, vector<8x32xf32> -> vector<8x32xf32>
    %c0_30 = arith.constant 0 : index
    %c0_31 = arith.constant 0 : index
    %42 = vector.load %arg9[%c0_30, %c0_31] : memref<1x32xf32, #tpu.memory_space<vmem>>, vector<1x32xf32>
    %43 = vector.broadcast %42 : vector<1x32xf32> to vector<8x32xf32>
    %44 = arith.addf %41, %43 : vector<8x32xf32>
    %45 = vector.extract_strided_slice %34 {offsets = [0, 0], sizes = [8, 16], strides = [1, 1]} : vector<8x32xf32> to vector<8x16xf32>
    %46 = vector.extract_strided_slice %39 {offsets = [0, 0], sizes = [8, 16], strides = [1, 1]} : vector<8x32xf32> to vector<8x16xf32>
    %47 = vector.extract_strided_slice %44 {offsets = [0, 0], sizes = [8, 16], strides = [1, 1]} : vector<8x32xf32> to vector<8x16xf32>
    %cst_32 = arith.constant dense<0.000000e+00> : vector<8x8xf32>
    %48 = tpu.matmul %45, %46, %cst_32 {dimension_numbers = #tpu.dot_dimension_numbers<[1], [1], [0], [0], [0, 0, 1, 0], [], []>} : vector<8x16xf32>, vector<8x16xf32>, vector<8x8xf32> -> vector<8x8xf32>
    %cst_33 = arith.constant 2.500000e-01 : f32
    %49 = vector.broadcast %cst_33 : f32 to vector<8x8xf32>
    %50 = arith.mulf %48, %49 : vector<8x8xf32>
    %51 = vector.extract_strided_slice %3 {offsets = [0, 0, 0], sizes = [1, 8, 8], strides = [1, 1, 1]} : vector<2x8x8xf32> to vector<1x8x8xf32>
    %52 = vector.shape_cast %51 : vector<1x8x8xf32> to vector<8x8xf32>
    %cst_34 = arith.constant 1.000000e+00 : f32
    %53 = vector.broadcast %cst_34 : f32 to vector<8x8xf32>
    %54 = arith.addf %53, %52 : vector<8x8xf32>
    %55 = arith.mulf %50, %54 : vector<8x8xf32>
    %cst_35 = arith.constant dense<0xFF800000> : vector<8xf32>
    %56 = vector.multi_reduction <maximumf>, %55, %cst_35 [1] : vector<8x8xf32> to vector<8xf32>
    %57 = vector.shape_cast %56 : vector<8xf32> to vector<8x1xf32>
    %58 = vector.broadcast %57 : vector<8x1xf32> to vector<8x8xf32>
    %59 = arith.subf %55, %58 : vector<8x8xf32>
    %60 = math.exp %59 : vector<8x8xf32>
    %cst_36 = arith.constant dense<0.000000e+00> : vector<8xf32>
    %61 = vector.multi_reduction <add>, %60, %cst_36 [1] : vector<8x8xf32> to vector<8xf32>
    %62 = vector.shape_cast %61 : vector<8xf32> to vector<8x1xf32>
    %63 = vector.broadcast %62 : vector<8x1xf32> to vector<8x8xf32>
    %64 = arith.divf %60, %63 : vector<8x8xf32>
    %cst_37 = arith.constant dense<0.000000e+00> : vector<8x16xf32>
    %65 = tpu.matmul %64, %47, %cst_37 {dimension_numbers = #tpu.dot_dimension_numbers<[1], [0], [0], [1], [0, 0, 1, 1], [], []>} : vector<8x8xf32>, vector<8x16xf32>, vector<8x16xf32> -> vector<8x16xf32>
    %66 = vector.extract_strided_slice %34 {offsets = [0, 16], sizes = [8, 16], strides = [1, 1]} : vector<8x32xf32> to vector<8x16xf32>
    %67 = vector.extract_strided_slice %39 {offsets = [0, 16], sizes = [8, 16], strides = [1, 1]} : vector<8x32xf32> to vector<8x16xf32>
    %68 = vector.extract_strided_slice %44 {offsets = [0, 16], sizes = [8, 16], strides = [1, 1]} : vector<8x32xf32> to vector<8x16xf32>
    %cst_38 = arith.constant dense<0.000000e+00> : vector<8x8xf32>
    %69 = tpu.matmul %66, %67, %cst_38 {dimension_numbers = #tpu.dot_dimension_numbers<[1], [1], [0], [0], [0, 0, 1, 0], [], []>} : vector<8x16xf32>, vector<8x16xf32>, vector<8x8xf32> -> vector<8x8xf32>
    %cst_39 = arith.constant 2.500000e-01 : f32
    %70 = vector.broadcast %cst_39 : f32 to vector<8x8xf32>
    %71 = arith.mulf %69, %70 : vector<8x8xf32>
    %72 = vector.extract_strided_slice %3 {offsets = [1, 0, 0], sizes = [1, 8, 8], strides = [1, 1, 1]} : vector<2x8x8xf32> to vector<1x8x8xf32>
    %73 = vector.shape_cast %72 : vector<1x8x8xf32> to vector<8x8xf32>
    %cst_40 = arith.constant 1.000000e+00 : f32
    %74 = vector.broadcast %cst_40 : f32 to vector<8x8xf32>
    %75 = arith.addf %74, %73 : vector<8x8xf32>
    %76 = arith.mulf %71, %75 : vector<8x8xf32>
    %cst_41 = arith.constant dense<0xFF800000> : vector<8xf32>
    %77 = vector.multi_reduction <maximumf>, %76, %cst_41 [1] : vector<8x8xf32> to vector<8xf32>
    %78 = vector.shape_cast %77 : vector<8xf32> to vector<8x1xf32>
    %79 = vector.broadcast %78 : vector<8x1xf32> to vector<8x8xf32>
    %80 = arith.subf %76, %79 : vector<8x8xf32>
    %81 = math.exp %80 : vector<8x8xf32>
    %cst_42 = arith.constant dense<0.000000e+00> : vector<8xf32>
    %82 = vector.multi_reduction <add>, %81, %cst_42 [1] : vector<8x8xf32> to vector<8xf32>
    %83 = vector.shape_cast %82 : vector<8xf32> to vector<8x1xf32>
    %84 = vector.broadcast %83 : vector<8x1xf32> to vector<8x8xf32>
    %85 = arith.divf %81, %84 : vector<8x8xf32>
    %cst_43 = arith.constant dense<0.000000e+00> : vector<8x16xf32>
    %86 = tpu.matmul %85, %68, %cst_43 {dimension_numbers = #tpu.dot_dimension_numbers<[1], [0], [0], [1], [0, 0, 1, 1], [], []>} : vector<8x8xf32>, vector<8x16xf32>, vector<8x16xf32> -> vector<8x16xf32>
    %87 = tpu.concatenate %65, %86 in 1 : vector<8x16xf32>, vector<8x16xf32> -> vector<8x32xf32>
    %c0_44 = arith.constant 0 : index
    %c0_45 = arith.constant 0 : index
    %88 = vector.load %arg12[%c0_44, %c0_45] : memref<32x32xf32, #tpu.memory_space<vmem>>, vector<32x32xf32>
    %cst_46 = arith.constant dense<0.000000e+00> : vector<8x32xf32>
    %89 = tpu.matmul %87, %88, %cst_46 {dimension_numbers = #tpu.dot_dimension_numbers<[1], [0], [0], [1], [0, 0, 1, 1], [], []>} : vector<8x32xf32>, vector<32x32xf32>, vector<8x32xf32> -> vector<8x32xf32>
    %c0_47 = arith.constant 0 : index
    %c0_48 = arith.constant 0 : index
    %90 = vector.load %arg13[%c0_47, %c0_48] : memref<1x32xf32, #tpu.memory_space<vmem>>, vector<1x32xf32>
    %91 = vector.broadcast %90 : vector<1x32xf32> to vector<8x32xf32>
    %92 = arith.addf %89, %91 : vector<8x32xf32>
    %93 = arith.addf %1, %92 : vector<8x32xf32>
    %c0_49 = arith.constant 0 : index
    %c0_50 = arith.constant 0 : index
    %94 = vector.load %arg14[%c0_49, %c0_50] : memref<1x32xf32, #tpu.memory_space<vmem>>, vector<1x32xf32>
    %c0_51 = arith.constant 0 : index
    %c0_52 = arith.constant 0 : index
    %95 = vector.load %arg15[%c0_51, %c0_52] : memref<1x32xf32, #tpu.memory_space<vmem>>, vector<1x32xf32>
    %cst_53 = arith.constant dense<0.000000e+00> : vector<8xf32>
    %96 = vector.multi_reduction <add>, %93, %cst_53 [1] : vector<8x32xf32> to vector<8xf32>
    %97 = vector.shape_cast %96 : vector<8xf32> to vector<8x1xf32>
    %cst_54 = arith.constant 3.200000e+01 : f32
    %98 = vector.broadcast %cst_54 : f32 to vector<8x1xf32>
    %99 = arith.divf %97, %98 : vector<8x1xf32>
    %100 = vector.broadcast %99 : vector<8x1xf32> to vector<8x32xf32>
    %101 = arith.subf %93, %100 : vector<8x32xf32>
    %102 = arith.mulf %101, %101 : vector<8x32xf32>
    %cst_55 = arith.constant dense<0.000000e+00> : vector<8xf32>
    %103 = vector.multi_reduction <add>, %102, %cst_55 [1] : vector<8x32xf32> to vector<8xf32>
    %104 = vector.shape_cast %103 : vector<8xf32> to vector<8x1xf32>
    %cst_56 = arith.constant 3.200000e+01 : f32
    %105 = vector.broadcast %cst_56 : f32 to vector<8x1xf32>
    %106 = arith.divf %104, %105 : vector<8x1xf32>
    %107 = vector.broadcast %99 : vector<8x1xf32> to vector<8x32xf32>
    %108 = arith.subf %93, %107 : vector<8x32xf32>
    %cst_57 = arith.constant 9.99999974E-6 : f32
    %109 = vector.broadcast %cst_57 : f32 to vector<8x1xf32>
    %110 = arith.addf %106, %109 : vector<8x1xf32>
    %111 = math.rsqrt %110 : vector<8x1xf32>
    %112 = vector.broadcast %111 : vector<8x1xf32> to vector<8x32xf32>
    %113 = arith.mulf %108, %112 : vector<8x32xf32>
    %114 = vector.broadcast %94 : vector<1x32xf32> to vector<8x32xf32>
    %115 = arith.mulf %113, %114 : vector<8x32xf32>
    %116 = vector.broadcast %95 : vector<1x32xf32> to vector<8x32xf32>
    %117 = arith.addf %115, %116 : vector<8x32xf32>
    %c0_58 = arith.constant 0 : index
    %c0_59 = arith.constant 0 : index
    %118 = vector.load %arg16[%c0_58, %c0_59] : memref<32x128xf32, #tpu.memory_space<vmem>>, vector<32x128xf32>
    %cst_60 = arith.constant dense<0.000000e+00> : vector<8x128xf32>
    %119 = tpu.matmul %117, %118, %cst_60 {dimension_numbers = #tpu.dot_dimension_numbers<[1], [0], [0], [1], [0, 0, 1, 1], [], []>} : vector<8x32xf32>, vector<32x128xf32>, vector<8x128xf32> -> vector<8x128xf32>
    %c0_61 = arith.constant 0 : index
    %c0_62 = arith.constant 0 : index
    %120 = vector.load %arg17[%c0_61, %c0_62] : memref<1x128xf32, #tpu.memory_space<vmem>>, vector<1x128xf32>
    %121 = vector.broadcast %120 : vector<1x128xf32> to vector<8x128xf32>
    %122 = arith.addf %119, %121 : vector<8x128xf32>
    %c0_63 = arith.constant 0 : index
    %c0_64 = arith.constant 0 : index
    %123 = vector.load %arg18[%c0_63, %c0_64] : memref<32x128xf32, #tpu.memory_space<vmem>>, vector<32x128xf32>
    %cst_65 = arith.constant dense<0.000000e+00> : vector<8x128xf32>
    %124 = tpu.matmul %117, %123, %cst_65 {dimension_numbers = #tpu.dot_dimension_numbers<[1], [0], [0], [1], [0, 0, 1, 1], [], []>} : vector<8x32xf32>, vector<32x128xf32>, vector<8x128xf32> -> vector<8x128xf32>
    %c0_66 = arith.constant 0 : index
    %c0_67 = arith.constant 0 : index
    %125 = vector.load %arg19[%c0_66, %c0_67] : memref<1x128xf32, #tpu.memory_space<vmem>>, vector<1x128xf32>
    %126 = vector.broadcast %125 : vector<1x128xf32> to vector<8x128xf32>
    %127 = arith.addf %124, %126 : vector<8x128xf32>
    %128 = vector.extract_strided_slice %127 {offsets = [0, 0], sizes = [8, 64], strides = [1, 1]} : vector<8x128xf32> to vector<8x64xf32>
    %129 = vector.extract_strided_slice %127 {offsets = [0, 64], sizes = [8, 64], strides = [1, 1]} : vector<8x128xf32> to vector<8x64xf32>
    %cst_68 = arith.constant dense<0.000000e+00> : vector<8x64xf32>
    %130 = tpu.matmul %5, %128, %cst_68 {dimension_numbers = #tpu.dot_dimension_numbers<[1], [0], [0], [1], [0, 0, 1, 1], [], []>} : vector<8x8xf32>, vector<8x64xf32>, vector<8x64xf32> -> vector<8x64xf32>
    %cst_69 = arith.constant dense<0.000000e+00> : vector<8x64xf32>
    %131 = tpu.matmul %5, %129, %cst_69 {dimension_numbers = #tpu.dot_dimension_numbers<[0], [0], [1], [1], [0, 1, 1, 1], [], []>} : vector<8x8xf32>, vector<8x64xf32>, vector<8x64xf32> -> vector<8x64xf32>
    %132 = tpu.concatenate %130, %131 in 1 : vector<8x64xf32>, vector<8x64xf32> -> vector<8x128xf32>
    %133 = arith.addf %122, %132 : vector<8x128xf32>
    %cst_70 = arith.constant 0.000000e+00 : f32
    %134 = vector.broadcast %cst_70 : f32 to vector<8x128xf32>
    %135 = arith.maximumf %133, %134 : vector<8x128xf32>
    %c0_71 = arith.constant 0 : index
    %c0_72 = arith.constant 0 : index
    %136 = vector.load %arg20[%c0_71, %c0_72] : memref<128x32xf32, #tpu.memory_space<vmem>>, vector<128x32xf32>
    %cst_73 = arith.constant dense<0.000000e+00> : vector<8x32xf32>
    %137 = tpu.matmul %135, %136, %cst_73 {dimension_numbers = #tpu.dot_dimension_numbers<[1], [0], [0], [1], [0, 0, 1, 1], [], []>} : vector<8x128xf32>, vector<128x32xf32>, vector<8x32xf32> -> vector<8x32xf32>
    %c0_74 = arith.constant 0 : index
    %c0_75 = arith.constant 0 : index
    %138 = vector.load %arg21[%c0_74, %c0_75] : memref<1x32xf32, #tpu.memory_space<vmem>>, vector<1x32xf32>
    %139 = vector.broadcast %138 : vector<1x32xf32> to vector<8x32xf32>
    %140 = arith.addf %137, %139 : vector<8x32xf32>
    %141 = arith.addf %93, %140 : vector<8x32xf32>
    %c0_76 = arith.constant 0 : index
    %c0_77 = arith.constant 0 : index
    %c0_78 = arith.constant 0 : index
    %142 = vector.load %arg22[%c0_76, %c0_77, %c0_78] : memref<1x8x32xf32, #tpu.memory_space<vmem>>, vector<1x8x32xf32>
    %143 = vector.shape_cast %142 : vector<1x8x32xf32> to vector<8x32xf32>
    %144 = vector.shape_cast %141 : vector<8x32xf32> to vector<1x8x32xf32>
    tpu.vector_store %arg22[%c0_76, %c0_77, %c0_78], %144 {strides = array<i32>} : memref<1x8x32xf32, #tpu.memory_space<vmem>>, vector<1x8x32xf32>,
    return
  }
  func.func @transform_0(%arg0: i32) -> (i32, i32, i32) {
    %c0_i32 = arith.constant 0 : i32
    %c0_i32_0 = arith.constant 0 : i32
    %c0_i32_1 = arith.constant 0 : i32
    return %arg0, %c0_i32, %c0_i32_0 : i32, i32, i32
  }
  func.func @transform_1(%arg0: i32) -> (i32, i32, i32, i32) {
    %c0_i32 = arith.constant 0 : i32
    %c0_i32_0 = arith.constant 0 : i32
    %c0_i32_1 = arith.constant 0 : i32
    %c0_i32_2 = arith.constant 0 : i32
    return %arg0, %c0_i32, %c0_i32_0, %c0_i32_1 : i32, i32, i32, i32
  }
  func.func @transform_2(%arg0: i32) -> (i32, i32, i32) {
    %c0_i32 = arith.constant 0 : i32
    %c0_i32_0 = arith.constant 0 : i32
    %c0_i32_1 = arith.constant 0 : i32
    return %arg0, %c0_i32, %c0_i32_0 : i32, i32, i32
  }
  func.func @transform_3(%arg0: i32) -> (i32, i32) {
    %c0_i32 = arith.constant 0 : i32
    %c0_i32_0 = arith.constant 0 : i32
    %c0_i32_1 = arith.constant 0 : i32
    return %c0_i32, %c0_i32_0 : i32, i32
  }
  func.func @transform_4(%arg0: i32) -> (i32, i32) {
    %c0_i32 = arith.constant 0 : i32
    %c0_i32_0 = arith.constant 0 : i32
    %c0_i32_1 = arith.constant 0 : i32
    return %c0_i32, %c0_i32_0 : i32, i32
  }
  func.func @transform_5(%arg0: i32) -> (i32, i32) {
    %c0_i32 = arith.constant 0 : i32
    %c0_i32_0 = arith.constant 0 : i32
    %c0_i32_1 = arith.constant 0 : i32
    return %c0_i32, %c0_i32_0 : i32, i32
  }
  func.func @transform_6(%arg0: i32) -> (i32, i32) {
    %c0_i32 = arith.constant 0 : i32
    %c0_i32_0 = arith.constant 0 : i32
    %c0_i32_1 = arith.constant 0 : i32
    return %c0_i32, %c0_i32_0 : i32, i32
  }
  func.func @transform_7(%arg0: i32) -> (i32, i32) {
    %c0_i32 = arith.constant 0 : i32
    %c0_i32_0 = arith.constant 0 : i32
    %c0_i32_1 = arith.constant 0 : i32
    return %c0_i32, %c0_i32_0 : i32, i32
  }
  func.func @transform_8(%arg0: i32) -> (i32, i32) {
    %c0_i32 = arith.constant 0 : i32
    %c0_i32_0 = arith.constant 0 : i32
    %c0_i32_1 = arith.constant 0 : i32
    return %c0_i32, %c0_i32_0 : i32, i32
  }
  func.func @transform_9(%arg0: i32) -> (i32, i32) {
    %c0_i32 = arith.constant 0 : i32
    %c0_i32_0 = arith.constant 0 : i32
    %c0_i32_1 = arith.constant 0 : i32
    return %c0_i32, %c0_i32_0 : i32, i32
  }
  func.func @transform_10(%arg0: i32) -> (i32, i32) {
    %c0_i32 = arith.constant 0 : i32
    %c0_i32_0 = arith.constant 0 : i32
    %c0_i32_1 = arith.constant 0 : i32
    return %c0_i32, %c0_i32_0 : i32, i32
  }
  func.func @transform_11(%arg0: i32) -> (i32, i32) {
    %c0_i32 = arith.constant 0 : i32
    %c0_i32_0 = arith.constant 0 : i32
    %c0_i32_1 = arith.constant 0 : i32
    return %c0_i32, %c0_i32_0 : i32, i32
  }
  func.func @transform_12(%arg0: i32) -> (i32, i32) {
    %c0_i32 = arith.constant 0 : i32
    %c0_i32_0 = arith.constant 0 : i32
    %c0_i32_1 = arith.constant 0 : i32
    return %c0_i32, %c0_i32_0 : i32, i32
  }
  func.func @transform_13(%arg0: i32) -> (i32, i32) {
    %c0_i32 = arith.constant 0 : i32
    %c0_i32_0 = arith.constant 0 : i32
    %c0_i32_1 = arith.constant 0 : i32
    return %c0_i32, %c0_i32_0 : i32, i32
  }
  func.func @transform_14(%arg0: i32) -> (i32, i32) {
    %c0_i32 = arith.constant 0 : i32
    %c0_i32_0 = arith.constant 0 : i32
    %c0_i32_1 = arith.constant 0 : i32
    return %c0_i32, %c0_i32_0 : i32, i32
  }
  func.func @transform_15(%arg0: i32) -> (i32, i32) {
    %c0_i32 = arith.constant 0 : i32
    %c0_i32_0 = arith.constant 0 : i32
    %c0_i32_1 = arith.constant 0 : i32
    return %c0_i32, %c0_i32_0 : i32, i32
  }
  func.func @transform_16(%arg0: i32) -> (i32, i32) {
    %c0_i32 = arith.constant 0 : i32
    %c0_i32_0 = arith.constant 0 : i32
    %c0_i32_1 = arith.constant 0 : i32
    return %c0_i32, %c0_i32_0 : i32, i32
  }
  func.func @transform_17(%arg0: i32) -> (i32, i32) {
    %c0_i32 = arith.constant 0 : i32
    %c0_i32_0 = arith.constant 0 : i32
    %c0_i32_1 = arith.constant 0 : i32
    return %c0_i32, %c0_i32_0 : i32, i32
  }
  func.func @transform_18(%arg0: i32) -> (i32, i32) {
    %c0_i32 = arith.constant 0 : i32
    %c0_i32_0 = arith.constant 0 : i32
    %c0_i32_1 = arith.constant 0 : i32
    return %c0_i32, %c0_i32_0 : i32, i32
  }
  func.func @transform_19(%arg0: i32) -> (i32, i32) {
    %c0_i32 = arith.constant 0 : i32
    %c0_i32_0 = arith.constant 0 : i32
    %c0_i32_1 = arith.constant 0 : i32
    return %c0_i32, %c0_i32_0 : i32, i32
  }
  func.func @transform_20(%arg0: i32) -> (i32, i32) {
    %c0_i32 = arith.constant 0 : i32
    %c0_i32_0 = arith.constant 0 : i32
    %c0_i32_1 = arith.constant 0 : i32
    return %c0_i32, %c0_i32_0 : i32, i32
  }
  func.func @transform_21(%arg0: i32) -> (i32, i32, i32) {
    %c0_i32 = arith.constant 0 : i32
    %c0_i32_0 = arith.constant 0 : i32
    %c0_i32_1 = arith.constant 0 : i32
    return %arg0, %c0_i32, %c0_i32_0 : i32, i32, i32
  }
}

</mosaic_0001>

<bundles_post_ra>
// kernel: tpu_custom_call.1
= control target key start
LH: loop header
LB: loop body
LE: loop exit
PB: predicated region body
PF: predicated region fallthrough
CT: control target
= control target key end

     0   :  { %s2274_s0 = inlined_call_operand.hbm [shape: f32[2,8,32], index: 0, kind: input, shape index: {}]   ;;  %s2275_s1 = inlined_call_operand.vmem [shape: f32[2,2,8,8], index: 1, kind: input, shape index: {}]   ;;  %s2276_s2 = inlined_call_operand.hbm [shape: f32[2,8,8], index: 2, kind: input, shape index: {}]   ;;  %s2277_s3 = inlined_call_operand.vmem [shape: f32[1,32], index: 3, kind: input, shape index: {}]   ;;  %s2278_s4 = inlined_call_operand.vmem [shape: f32[1,32], index: 4, kind: input, shape index: {}]   ;;  %s2279_s5 = inlined_call_operand.vmem [shape: f32[32,32], index: 5, kind: input, shape index: {}]   ;;  %s2280_s6 = inlined_call_operand.vmem [shape: f32[1,32], index: 6, kind: input, shape index: {}]   ;;  %s2281_s7 = inlined_call_operand.vmem [shape: f32[32,32], index: 7, kind: input, shape index: {}]   ;;  %s2282_s8 = inlined_call_operand.vmem [shape: f32[1,32], index: 8, kind: input, shape index: {}]   ;;  %s2283_s9 = inlined_call_operand.vmem [shape: f32[32,32], index: 9, kind: input, shape index: {}]   ;;  %s2284_s10 = inlined_call_operand.vmem [shape: f32[1,32], index: 10, kind: input, shape index: {}]   ;;  %s2285_s11 = inlined_call_operand.vmem [shape: f32[32,32], index: 11, kind: input, shape index: {}]   ;;  %s2286_s12 = inlined_call_operand.vmem [shape: f32[1,32], index: 12, kind: input, shape index: {}]   ;;  %s2287_s13 = inlined_call_operand.vmem [shape: f32[1,32], index: 13, kind: input, shape index: {}]   ;;  %s2288_s14 = inlined_call_operand.vmem [shape: f32[1,32], index: 14, kind: input, shape index: {}]   ;;  %s2289_s15 = inlined_call_operand.hbm [shape: f32[32,128], index: 15, kind: input, shape index: {}]   ;;  %s2290_s16 = inlined_call_operand.vmem [shape: f32[1,128], index: 16, kind: input, shape index: {}]   ;;  %s2291_s17 = inlined_call_operand.hbm [shape: f32[32,128], index: 17, kind: input, shape index: {}]   ;;  %s2292_s18 = inlined_call_operand.vmem [shape: f32[1,128], index: 18, kind: input, shape index: {}]   ;;  %s2293_s19 = inlined_call_operand.vmem [shape: f32[128,32], index: 19, kind: input, shape index: {}]   ;;  %s2294_s20 = inlined_call_operand.vmem [shape: f32[1,32], index: 20, kind: input, shape index: {}]   ;;  %s2295_s21 = inlined_call_operand.hbm [shape: f32[2,8,32], index: 21, kind: output, shape index: {}]  }
   0x1   :  { %2309 = sst [smem:[#allocation23_spill]] %s2274_s0 }
   0x2   :  { %2310 = sst [smem:[#allocation24_spill]] %s2275_s1 }
   0x3   :  { %2311 = sst [smem:[#allocation25_spill]] %s2276_s2 }
   0x4   :  { %2312 = sst [smem:[#allocation26_spill]] %s2277_s3 }
   0x5   :  { %2313 = sst [smem:[#allocation27_spill]] %s2278_s4 }
   0x6   :  { %2314 = sst [smem:[#allocation28_spill]] %s2279_s5 }
   0x7   :  { %2315 = sst [smem:[#allocation29_spill]] %s2287_s13 }
   0x8   :  { %2316 = sst [smem:[#allocation30_spill]] %s2288_s14 }
   0x9   :  { %2317 = sst [smem:[#allocation31_spill]] %s2289_s15 }
   0xa   :  { %2318 = sst [smem:[#allocation32_spill]] %s2290_s16 }
   0xb   :  { %2319 = sst [smem:[#allocation33_spill]] %s2291_s17 }
   0xc   :  { %2320 = sst [smem:[#allocation34_spill]] %s2292_s18 }
   0xd   :  { %2321 = sst [smem:[#allocation35_spill]] %s2293_s19 }
   0xe   :  { %2322 = sst [smem:[#allocation36_spill]] %s2294_s20 }
   0xf   :  { %2323 = sst [smem:[#allocation37_spill]] %s2295_s21 }
  0x10   :  { %26 = vsyncpa [#allocation3], 0 }
  0x11   :  { %28 = vsyncpa [#allocation3 + $0x1], 0 }
  0x12   :  { %29 = vsyncpa [#allocation6], 0 }
  0x13   :  { %31 = vsyncpa [#allocation6 + $0x1], 0 }
  0x14   :  { %32 = vsyncpa [#allocation9], 0 }
  0x15   :  { %33 = vsyncpa [#allocation4], 0 }
  0x16   :  { %35 = vsyncpa [#allocation4 + $0x1], 0  ;;  %s1915_s2 = smov 0   ;;  %s1917_s25 = smov 0  }
  0x17   :  { %s1919_s26 = smov 0   ;;  %s1921_s27 = smov 0  }
  0x18 LB: > { %2324 = sst [smem:[#allocation16_spill]] %s1783_s2  ;;  %s1939_s0 = sadd.s32 4294967295, %s1795_s27   ;;  %s1795_s27 = sphi %s1921_s27, %s2357_s27   ;;  %s1791_s26 = sphi %s1919_s26, %s2359_s26   ;;  %s1787_s25 = sphi %s1917_s25, %s2361_s25   ;;  %s1783_s2 = sphi %s1915_s2, %s2360_s2  }
  0x19   : > { %2325 = sst [smem:[#allocation17_spill]] %s1791_s26  ;;  %p1458_p0 = scmp.ge.s32.totalorder %s1795_s27, 1 }
  0x1a   : > { %2326 = sst [smem:[#allocation18_spill]] %s1795_s27  ;;  %p62_p1 = scmp.eq.s32.totalorder %s1939_s0, 0 }
  0x1b   : > { %s2327_s15 = sld [smem:[#allocation31_spill]]  ;;  %p528_p2 = scmp.lt.s32.totalorder %s1795_s27, 3 }
  0x1c   : > { %s1797_s30 = smov [#allocation7]   ;;  %s2329_s17 = sld [smem:[#allocation33_spill]] }
  0x1d   : > { %p1944_p3 = pnand %p1458_p0, %p528_p2  ;;  %s577_s5 = sshll.u32 %s1797_s30, 4  ;;  %s578_s5 = int_to_ptr.vmem [resolvable:$true] %s577_s5 }
  0x1e   : > { %s1798_s24 = smov [#allocation8]   ;;  %s1799_s28 = smov 128  }
  0x1f   : > { %p1507_p4 = pneg %p1944_p3  ;;  %s594_s3 = sshll.u32 %s1798_s24, 4  ;;  %s595_s3 = int_to_ptr.vmem [resolvable:$true] %s594_s3 }
  0x20   : > { %s1800_s30 = smov 8   ;;  %s1457_s22 = sadd.s32 4294967294, %s1795_s27  }
  0x21   : > { %s575_s29 = sshll.u32 %s2327_s15, 4  ;;  %p1508_p6 = pnand %p1507_p4, %p62_p1  ;;  %s576_s29 = int_to_ptr.hbm [resolvable:$true] %s575_s29 }
  0x22   : > { %s592_s1 = sshll.u32 %s2329_s17, 4  ;;  %s1958_s23 = sadd.s32 1, %s1795_s27   ;;  %s593_s1 = int_to_ptr.hbm [resolvable:$true] %s592_s1 }
  0x23   : > { %1510 = dma.hbm_to_vmem [thread:$0]  (!%p1508_p6), %s576_s29, 512, %s578_s5, [#allocation6], %s1799_s28, %s1799_s28, %s1800_s30  }
  0x24   : > { %1513 = dma.hbm_to_vmem [thread:$0]  (!%p1508_p6), %s593_s1, 512, %s595_s3, [#allocation9], %s1799_s28, %s1799_s28, %s1800_s30  }
  0x25   : > { %2330 = sst [smem:[#allocation19_spill]] %s1958_s23  ;;  %s45_s15 = ssub.s32 %s1795_s27, %s1958_s23 }
  0x26   : > { %s48_s17 = sadd.s32 1, %s1791_s26  ;;  %p46_p7 = scmp.eq.s32.totalorder %s45_s15, 0 }
  0x27   : > { %p55_p8 = scmp.ne.s32.totalorder %s1791_s26, %s1787_s25  ;;  %p56_p9 = scmp.eq.s32.totalorder %s1795_s27, 0 }
  0x28   : > { %p61_p10 = scmp.ne.s32.totalorder %s1787_s25, %s1783_s2  ;;  %p515_p13 = scmp.eq.s32.totalorder %s1939_s0, 1 }
  0x29   : > { %s1969_s24 = scalar_select %p46_p7, %s1791_s26, %s48_s17  }
  0x2a   : > { %p1971_p11 = por %p56_p9, %p55_p8  ;;  %p1977_p12 = por %p62_p1, %p61_p10 }
  0x2b   : > { %2331 = sst [smem:[#allocation20_spill]] %s1969_s24  ;;  %p521_p0 = scmp.eq.s32.totalorder %s1457_s22, 1 }
  0x2c   : > { %p1527_p2 = scmp.lt.s32.totalorder %s1795_s27, 2  ;;  %s617_s15 = sand.u32 1, %s1791_s26  }
  0x2d   : > { %p1984_p4 = por %p515_p13, %p55_p8  ;;  %p1988_p6 = por %p521_p0, %p61_p10 }
  0x2e   : > { %s1992_s1 = sshll.u32 %s617_s15, 3  ;;  %s1463_s3 = sshll.u32 %s1795_s27, 3 }
  0x2f   : > { %s2334_s5 = scalar_select %p1984_p4, 1, 0 }
  0x30   : > { %s2336_s17 = scalar_select %p1988_p6, 1, 0 }
  0x31   : > { %2335 = sst [smem:[#allocation21_spill]] %s2334_s5  ;;  %s621_s2 = scalar_lea.vmem [#allocation2], %s1992_s1 }
  0x32   : > { %2337 = sst [smem:[#allocation22_spill]] %s2336_s17  ;;  %s629_s22 = sshll.u32 %s621_s2, 4  ;;  %s630_s22 = int_to_ptr.vmem [resolvable:$true] %s629_s22 }
  0x33   : > { %s2338_s24 = sld [smem:[#allocation23_spill]]  ;;  %p2001_p7 = pnand %p1527_p2, %p1971_p11 }
  0x34   : > { %s2340_s16 = sld [smem:[#allocation25_spill]]  ;;  %s644_s18 = sand.u32 1, %s1795_s27  }
  0x35   : > { %s618_s14 = scalar_lea.sflag [#allocation3], %s617_s15  ;;  %p1661_p9 = pneg %p2001_p7 }
  0x39   : > { %s625_s23 = scalar_lea.hbm %s2338_s24, %s1463_s3 }
  0x3a   : > { %s627_s20 = sshll.u32 %s625_s23, 4  ;;  %s652_s19 = scalar_lea.hbm %s2340_s16, %s1463_s3  ;;  %s628_s20 = int_to_ptr.hbm [resolvable:$true] %s627_s20 }
  0x3b   : > { %s1657_s28 = sshra.s32 %s628_s20, 4  ;;  %s1664_s23 = scalar_lea.hbm %s2338_s24, 16  ;;  %s1658_s28 = int_to_ptr.hbm [resolvable:$true] %s1657_s28 }
  0x3c   : > { %s1659_s30 = scalar_lea.hbm %s1658_s28, 8  ;;  %p1665_p13 = scmp.lt.s32.totalorder %s1658_s28, %s2338_s24 }
  0x3d   : > { %p1660_p8 = scmp.ne.s32.totalorder %s1658_s28, %s1659_s30  ;;  %p1666_p0 = scmp.lt.s32.totalorder %s1664_s23, %s1659_s30 }
  0x3f   : > { %p1662_p10 = pnand %p1661_p9, %p1660_p8  ;;  %p1667_p2 = por %p1666_p0, %p1665_p13 }
  0x41   : > { %p1663_p11 = pneg %p1662_p10 }
  0x43   : > { %p1668_p5 = pnand %p1667_p2, %p1663_p11 }
  0x45   : > { %1671 = shalt.err (!%p1668_p5)
}
  0x46   : > { %1517 = dma.hbm_to_vmem [thread:$0]  (!%p2001_p7), %s628_s20, 128, %s630_s22, %s618_s14  }
  0x47   : > { %s654_s15 = sshll.u32 %s652_s19, 4  ;;  %s648_s3 = scalar_lea.vmem [#allocation5], %s1992_s1  ;;  %s655_s15 = int_to_ptr.hbm [resolvable:$true] %s654_s15 }
  0x48   : > { %s656_s27 = sshll.u32 %s648_s3, 4  ;;  %s645_s21 = scalar_lea.sflag [#allocation6], %s644_s18  ;;  %s657_s27 = int_to_ptr.vmem [resolvable:$true] %s656_s27 }
  0x49   : > { %s1687_s2 = sshra.s32 %s655_s15, 4  ;;  %s1694_s23 = scalar_lea.hbm %s2340_s16, 16  ;;  %s1688_s2 = int_to_ptr.hbm [resolvable:$true] %s1687_s2 }
  0x4a   : > { %s1689_s13 = scalar_lea.hbm %s1688_s2, 8  ;;  %p1695_p5 = scmp.lt.s32.totalorder %s1688_s2, %s2340_s16 }
  0x4b   : > { %p1690_p8 = scmp.ne.s32.totalorder %s1688_s2, %s1689_s13  ;;  %p1696_p13 = scmp.lt.s32.totalorder %s1694_s23, %s1689_s13 }
  0x4d   : > { %p1692_p10 = pnand %p1690_p8, %p1661_p9  ;;  %p1697_p0 = por %p1696_p13, %p1695_p5 }
  0x4f   : > { %p1693_p11 = pneg %p1692_p10 }
  0x51   : > { %p1698_p2 = pnand %p1697_p0, %p1693_p11 }
  0x53   : > { %1701 = shalt.err (!%p1698_p2)
}
  0x54   : > { %1520 = dma.hbm_to_vmem [thread:$0]  (!%p2001_p7), %s655_s15, 128, %s657_s27, %s645_s21  }
  0x55   : > { %665 = sbr.rel (%p1944_p3) target bundleno = 2245 (0x8c5), region = 104  ;;  %s2037_s18 = sand.u32 (!%p1944_p3), 1, %s1787_s25  }
  0x56   : > { %s2040_s19 = sshll.u32 (!%p1944_p3), %s2037_s18, 3  ;;  %s668_s20 = scalar_lea.sflag (!%p1944_p3), [#allocation3], %s2037_s18 }
  0x57   : > { %s671_s13 = scalar_lea.vmem (!%p1944_p3), [#allocation2], %s2040_s19 }
  0x5a   : > { %1762 = dma.done.wait (%p1977_p12), %s668_s20, 128  }
  0x5b   : > { %1764 = vsyncadd (%p1977_p12), %s668_s20, 4294967168  ;;  %s677_s26 = sand.u32 1, %s1939_s0   ;;  %s681_s4 = scalar_lea.vmem [#allocation5], %s2040_s19 }
  0x5c   : > { %s678_s27 = scalar_lea.sflag [#allocation6], %s677_s26 }
  0x5d   : > { %1766 = dma.done.wait (%p1977_p12), %s678_s27, 128  }
  0x5e   : > { %1768 = vsyncadd (%p1977_p12), %s678_s27, 4294967168 }
  0x5f   : > { %1770 = dma.done.wait (%p62_p1), [#allocation6], 512  }
  0x60   : > { %1772 = vsyncadd (%p62_p1), [#allocation6], 4294966784 }
  0x61   : > { %1774 = dma.done.wait (%p62_p1), [#allocation9], 512  }
  0x62   : > { %1776 = vsyncadd (%p62_p1), [#allocation9], 4294966784  ;;  %vm772_vm0 = vcmask 261120   ;;  %v2062_v0 = vld [vmem:[%s671_s13] sm:$0xff]  ;;  %v1801_v2 = vmov 32.0   ;;  %v813_v14 = vld [vmem:[%s2283_s9 + $0x18] sm:$0xff] }
  0x63   : > { %v773_v1 = vsel %vm772_vm0, %v2062_v0, 0.0  ;;  %1583 = vrcp.f32 %v1801_v2  ;;  %s2341_s15 = sld [smem:[#allocation28_spill]]  ;;  %v872_v16 = vld [vmem:[%s2281_s7 + $0x18] sm:$0xff]  ;;  %833 = vmatpush.msra.mxu0 %v813_v14  ;;  %v812_v17 = vld [vmem:[%s2283_s9 + $0x10] sm:$0xff]  ;;  %v811_v20 = vld [vmem:[%s2283_s9 + $0x8] sm:$0xff]  ;;  %vm897_vm5 = vcmask 130048  }
  0x64   : > { %774 = vadd.xlane.f32.xlu0 %v773_v1  ;;  %v871_v19 = vld [vmem:[%s2281_s7 + $0x10] sm:$0xff]  ;;  %889 = vmatpush.msra.mxu2 %v872_v16  ;;  %v870_v22 = vld [vmem:[%s2281_s7 + $0x8] sm:$0xff]  ;;  %v810_v23 = vld [vmem:[%s2283_s9] sm:$0xff]  ;;  %s2342_s5 = sld [smem:[#allocation26_spill]]  ;;  %s1802_s22 = smov 112   ;;  %vm927_vm6 = vcmask 64512  }
  0x65   : > { %834 = vmatpush.msra.mxu0 %v812_v17  ;;  %v869_v25 = vld [vmem:[%s2281_s7] sm:$0xff]  ;;  %s2343_s13 = sld [smem:[#allocation27_spill]]  ;;  %p761_p1 = scmp.lt.s32.totalorder %s1939_s0, 1 }
  0x66   : > { %890 = vmatpush.msra.mxu2 %v871_v19  ;;  %v1575_v41 = vld [vmem:[%s2280_s6] ss:$0 sm:$0xff]  ;;  %s2344_s23 = sld [smem:[#allocation24_spill]]  ;;  %s1803_s1 = smov 16  }
  0x67   : > { %835 = vmatpush.msra.mxu0 %v811_v20  ;;  %v1574_v42 = vld [vmem:[%s2284_s10] ss:$0 sm:$0xff]  ;;  %s762_s21 = scalar_select %p761_p1, %s1939_s0, 1 }
  0x68   : > { %891 = vmatpush.msra.mxu2 %v870_v22  ;;  %v1576_v47 = vld [vmem:[%s2282_s8] ss:$0 sm:$0xff]  ;;  %s2345_s30 = sld [smem:[#allocation29_spill]]  ;;  %s1804_s26 = smov 64  }
  0x69   : > { %v1584_v3 = vpop.eup %1583  ;;  %v844_v15 = vld [vmem:[%s2341_s15 + $0x18] sm:$0xff]  ;;  %v843_v18 = vld [vmem:[%s2341_s15 + $0x10] sm:$0xff]  ;;  %v842_v21 = vld [vmem:[%s2341_s15 + $0x8] sm:$0xff]  ;;  %836 = vmatpush.msra.mxu0 %v810_v23  ;;  %s1492_s2 = sshll.u32 %s762_s21, 4  ;;  %s2349_s17 = sld [smem:[#allocation32_spill]] }
  0x6a   : > { %v777_v4 = vmul.f32 32.0, %v1584_v3  ;;  %vm781_vm1 = vweird.f32 %v1584_v3  ;;  %861 = vmatpush.msra.mxu1 %v844_v15  ;;  %v841_v24 = vld [vmem:[%s2341_s15] sm:$0xff]  ;;  %892 = vmatpush.msra.mxu2 %v869_v25  ;;  %s1489_s3 = sshll.u32 %s1939_s0, 3  ;;  %s2350_s28 = sld [smem:[#allocation36_spill]] }
  0x6b   : > { %v1572_v35 = vld [vmem:[%s2342_s5] ss:$0 sm:$0xff]  ;;  %s760_s20 = scalar_lea.vmem [#allocation10], %s2040_s19  ;;  %s1318_s0 = scalar_lea.sflag [#allocation4], %s2037_s18 }
  0x6c   : > { %v778_v5 = vsub.f32 1.0, %v777_v4  ;;  %862 = vmatpush.msra.mxu1 %v843_v18  ;;  %v1573_v38 = vld [vmem:[%s2343_s13] ss:$0 sm:$0xff]  ;;  %s765_s5 = scalar_lea.vmem %s2344_s23, %s1492_s2  ;;  %s2347_s13 = sld [smem:[#allocation34_spill]] }
  0x6d   : > { %v768_v54 = vld [vmem:[%s765_s5 + $0x8] sm:$0xff]  ;;  %v767_v58 = vld [vmem:[%s765_s5] sm:$0xff]  ;;  %s2346_s5 = sld [smem:[#allocation30_spill]] }
  0x6e   : > { %v779_v6 = vmul.f32 %v1584_v3, %v778_v5  ;;  %863 = vmatpush.msra.mxu1 %v842_v21  ;;  %v1004_v55 = vadd.f32 1.0, %v768_v54  ;;  %v925_v62 = vadd.f32 1.0, %v767_v58  ;;  %v1127_v58 = vld [vmem:[#allocation7 + $0x8] sm:$0xff]  ;;  %s2351_s23 = sld [smem:[#allocation37_spill]] }
  0x70   : > { %v780_v7 = vadd.f32 %v1584_v3, %v779_v6  ;;  %864 = vmatpush.msra.mxu1 %v841_v24 }
  0x72   : > { %v2066_v8 = vsel %vm781_vm1, %v1584_v3, %v780_v7 }
  0x74   : > { %s1328_s14 = scalar_lea.hbm %s2351_s23, %s1489_s3  ;;  %s1737_s19 = scalar_lea.hbm %s2351_s23, 16 }
  0x75   : > { %s1332_s27 = sshll.u32 %s1328_s14, 4  ;;  %s1333_s27 = int_to_ptr.hbm [resolvable:$true] %s1332_s27 }
  0x76   : > { %s1731_s29 = sshra.s32 %s1333_s27, 4  ;;  %s1732_s29 = int_to_ptr.hbm [resolvable:$true] %s1731_s29 }
  0x77   : > { %p1738_p9 = scmp.lt.s32.totalorder %s1732_s29, %s2351_s23 }
  0xd7   : > { %v775_v9 = vpop.xlane.xlu0 %774 }
  0xd8   : > { %v783_v10 = vmul.f32 %v2066_v8, %v775_v9 }
  0xda   : > { %v784_v11 = vsub.f32 %v2062_v0, %v783_v10 }
  0xdc   : > { %v785_v12 = vmul.f32 %v784_v11, %v784_v11 }
  0xde   : > { %v786_v13 = vsel %vm772_vm0, %v785_v12, 0.0 }
  0xdf   : > { %787 = vadd.xlane.f32.xlu0 %v786_v13 }
 0x152   : > { %v788_v26 = vpop.xlane.xlu0 %787 }
 0x153   : > { %v789_v27 = vmul.f32 %v788_v26, %v2066_v8 }
 0x155   : > { %v790_v28 = vadd.f32 1e-05, %v789_v27 }
 0x157   : > { %1585 = vrsqrt.f32 %v790_v28  ;;  %vm797_vm3 = vweird.f32 %v790_v28 }
 0x15d   : > { %v1586_v29 = vpop.eup %1585 }
 0x15e   : > { %v792_v30 = vmul.f32 %v1586_v29, %v790_v28  ;;  %vm798_vm2 = vweird.f32 %v1586_v29 }
 0x15f   : > { %vm799_vm4 = vmor %vm797_vm3, %vm798_vm2  ;;  %vm1271_vm3 = vcmask 523264  }
 0x160   : > { %v793_v31 = vmul.f32 %v1586_v29, %v792_v30 }
 0x162   : > { %v794_v32 = vmul.f32 0.5, %v793_v31 }
 0x164   : > { %v795_v33 = vsub.f32 1.5, %v794_v32 }
 0x166   : > { %v796_v34 = vmul.f32 %v1586_v29, %v795_v33 }
 0x168   : > { %v800_v36 = vsel %vm799_vm4, %v1586_v29, %v796_v34 }
 0x169   : > { %v801_v37 = vmul.f32 %v800_v36, %v784_v11 }
 0x16b   : > { %v805_v39 = vmul.f32 %v1572_v35, %v801_v37  ;;  %v1065_v37 = vld [vmem:[%s2285_s11 + $0x18] sm:$0xff] }
 0x16d   : > { %v809_v40 = vadd.f32 %v1573_v38, %v805_v39  ;;  %v1064_v38 = vld [vmem:[%s2285_s11 + $0x10] sm:$0xff]  ;;  %v1063_v39 = vld [vmem:[%s2285_s11 + $0x8] sm:$0xff] }
 0x16f   : > { %1474 = vmatmul.msk.f32.vlgmr.msra.gmra.mxu0 %vm772_vm0, %v809_v40  ;;  %1475 = vmatmul.msk.f32.vlgmr.msra.gmra.mxu1 %vm772_vm0, %v809_v40 }
 0x170   : > { %1476 = vmatmul.msk.f32.vlgmr.msra.gmra.mxu2 %vm772_vm0, %v809_v40 }
 0x1ec   : > { %v866_v43 = vpop.f32.mrf.mxu1  ;;  %v838_v44 = vpop.f32.mrf.mxu0 }
 0x1ed   : > { %v867_v45 = vadd.f32 %v1575_v41, %v866_v43  ;;  %v839_v46 = vadd.f32 %v1574_v42, %v838_v44  ;;  %v1062_v41 = vld [vmem:[%s2285_s11] sm:$0xff] }
 0x1ef   : > { %977 = vrot.lane.b32.xlu1 %v867_v45, %s1802_s22  ;;  %1477 = vmatpush.xpose.msk.msrb.mxu0 %vm897_vm5, %v867_v45  ;;  %v1577_v45 = vld [vmem:[%s2286_s12] ss:$0 sm:$0xff] }
 0x1f2   : > { %1478 = vmatmul.msk.f32.vlgmr.msrb.gmra.mxu0 %vm897_vm5, %v839_v46 }
 0x1f3   : > { %v894_v48 = vpop.f32.mrf.mxu2 }
 0x1f4   : > { %v895_v49 = vadd.f32 %v1576_v47, %v894_v48 }
 0x1f6   : > { %970 = vmatpush.msrb.mxu2 %v895_v49 }
 0x1f7   : > { %975 = vrot.lane.b32.xlu1 %v839_v46, %s1802_s22 }
 0x1f8   : > { %1085 = vmatpush.msra.mxu2 %v1065_v37 }
 0x1fa   : > { %1086 = vmatpush.msra.mxu2 %v1064_v38  ;;  %v1580_v38 = vld [vmem:[%s2349_s17] ss:$0 sm:$0xff] }
 0x1fc   : > { %1087 = vmatpush.msra.mxu2 %v1063_v39 }
 0x1fe   : > { %1088 = vmatpush.msra.mxu2 %v1062_v41 }
 0x1ff   : > { %1031 = vrot.lane.b32.xlu1 %v895_v49, %s1802_s22  ;;  %s1733_s22 = scalar_lea.hbm %s1732_s29, 8 }
 0x200   : > { %p1734_p3 = scmp.ne.s32.totalorder %s1732_s29, %s1733_s22  ;;  %p1739_p8 = scmp.lt.s32.totalorder %s1737_s19, %s1733_s22 }
 0x202   : > { %p1735_p12 = pnand %p1734_p3, %p1984_p4  ;;  %p1740_p10 = por %p1739_p8, %p1738_p9 }
 0x204   : > { %p1736_p7 = pneg %p1735_p12 }
 0x206   : > { %p1741_p11 = pnand %p1740_p10, %p1736_p7 }
 0x261   : > { %v978_v50 = vpop.permute.xlu1 %977 }
 0x262   : > { %1480 = vmatpush.xpose.msk.msra.mxu0 %vm897_vm5, %v978_v50 }
 0x269   : > { %v976_v51 = vpop.permute.xlu1 %975 }
 0x26a   : > { %1481 = vmatmul.msk.f32.vlgmr.msra.gmra.mxu0 %vm897_vm5, %v976_v51 }
 0x26f   : > { %v921_v53 = vpop.f32.mrf.mxu0 }
 0x270   : > { %v924_v60 = vmul.f32 0.25, %v921_v53 }
 0x271   : > { %v1032_v52 = vpop.permute.xlu1 %1031 }
 0x272   : > { %1052 = vmatpush.msrb.mxu1 %v1032_v52  ;;  %v926_v63 = vmul.f32 %v925_v62, %v924_v60  ;;  %v1126_v60 = vld [vmem:[#allocation7] sm:$0xff]  ;;  %v769_v62 = vld [vmem:[%s681_s4] sm:$0xff] }
 0x274   : > { %v928_v1 = vsel %vm927_vm6, %v926_v63, -inf }
 0x2e7   : > { %v1000_v56 = vpop.f32.mrf.mxu0 }
 0x2e8   : > { %v1003_v57 = vmul.f32 0.25, %v1000_v56  ;;  %v1160_v56 = vld [vmem:[#allocation8 + $0x18] sm:$0xff] }
 0x2e9   : > { %1177 = vmatpush.msrb.mxu0 %v1160_v56 }
 0x2ea   : > { %v1005_v59 = vmul.f32 %v1004_v55, %v1003_v57  ;;  %v1129_v55 = vld [vmem:[#allocation7 + $0x18] sm:$0xff]  ;;  %v1159_v57 = vld [vmem:[#allocation8 + $0x10] sm:$0xff] }
 0x2eb   : > { %1149 = vmatpush.msra.mxu1 %v1129_v55  ;;  %1178 = vmatpush.msrb.mxu0 %v1159_v57 }
 0x2ec   : > { %v1006_v61 = vsel %vm927_vm6, %v1005_v59, -inf }
 0x2ed   : > { %1007 = vmax.xlane.f32.xlu2 %v1006_v61  ;;  %v1157_v61 = vld [vmem:[#allocation8] sm:$0xff] }
 0x2f5   : > { %929 = vmax.xlane.f32.xlu2 %v928_v1 }
 0x360   : > { %v1008_v2 = vpop.xlane.xlu2 %1007 }
 0x361   : > { %v1009_v3 = vsub.f32 %v1005_v59, %v1008_v2  ;;  %v1158_v59 = vld [vmem:[#allocation8 + $0x8] sm:$0xff] }
 0x362   : > { %1179 = vmatpush.msrb.mxu0 %v1158_v59 }
 0x363   : > { %v1010_v4 = vmul.f32 1.442695, %v1009_v3 }
 0x364   : > { %1180 = vmatpush.msrb.mxu0 %v1157_v61 }
 0x365   : > { %1587 = vpow2.f32 %v1010_v4 }
 0x368   : > { %v930_v5 = vpop.xlane.xlu2 %929 }
 0x369   : > { %v931_v6 = vsub.f32 %v926_v63, %v930_v5 }
 0x36b   : > { %v1588_v7 = vpop.eup %1587  ;;  %v932_v9 = vmul.f32 1.442695, %v931_v6 }
 0x36c   : > { %v1012_v10 = vsel %vm927_vm6, %v1588_v7, 0.0 }
 0x36d   : > { %1589 = vpow2.f32 %v932_v9  ;;  %1013 = vadd.xlane.f32.xlu0 %v1012_v10  ;;  %v1578_v10 = vld [vmem:[%s2345_s30] ss:$0 sm:$0xff] }
 0x373   : > { %v1590_v11 = vpop.eup %1589 }
 0x374   : > { %v934_v12 = vsel %vm927_vm6, %v1590_v11, 0.0 }
 0x375   : > { %935 = vadd.xlane.f32.xlu2 %v934_v12 }
 0x3e0   : > { %v1014_v13 = vpop.xlane.xlu0 %1013 }
 0x3e1   : > { %1591 = vrcp.f32 %v1014_v13  ;;  %v1026_v18 = vand.u32 2147483648, %v1014_v13  ;;  %v1024_v20 = vand.u32 2147483647, %v1014_v13  ;;  %vm1020_vm8 = vweird.f32 %v1014_v13 }
 0x3e3   : > { %v1027_v23 = vor.u32 1.1754944e-38, %v1026_v18  ;;  %vm1025_vm10 = vcmp.eq.f32.partialorder %v1024_v20, 8.507059e+37 }
 0x3e7   : > { %v1592_v14 = vpop.eup %1591 }
 0x3e8   : > { %v1016_v15 = vmul.f32 %v1592_v14, %v1014_v13  ;;  %v936_v16 = vpop.xlane.xlu2 %935  ;;  %vm1021_vm7 = vweird.f32 %v1592_v14 }
 0x3e9   : > { %1593 = vrcp.f32 %v936_v16  ;;  %vm1022_vm9 = vmor %vm1020_vm8, %vm1021_vm7  ;;  %v948_v29 = vand.u32 2147483648, %v936_v16  ;;  %v946_v31 = vand.u32 2147483647, %v936_v16  ;;  %vm942_vm12 = vweird.f32 %v936_v16 }
 0x3ea   : > { %v1017_v17 = vsub.f32 1.0, %v1016_v15  ;;  %v1581_v15 = vld [vmem:[%s2347_s13] ss:$0 sm:$0xff]  ;;  %s1330_s13 = sshll.u32 %s760_s20, 4  ;;  %s1331_s13 = int_to_ptr.vmem [resolvable:$true] %s1330_s13 }
 0x3eb   : > { %v949_v33 = vor.u32 1.1754944e-38, %v948_v29  ;;  %vm947_vm14 = vcmp.eq.f32.partialorder %v946_v31, 8.507059e+37 }
 0x3ec   : > { %v1018_v19 = vmul.f32 %v1592_v14, %v1017_v17 }
 0x3ee   : > { %v1019_v21 = vadd.f32 %v1592_v14, %v1018_v19 }
 0x3ef   : > { %v1594_v22 = vpop.eup %1593 }
 0x3f0   : > { %v938_v24 = vmul.f32 %v1594_v22, %v936_v16  ;;  %v1023_v25 = vsel %vm1022_vm9, %v1592_v14, %v1019_v21  ;;  %vm943_vm11 = vweird.f32 %v1594_v22 }
 0x3f1   : > { %v1028_v26 = vsel %vm1025_vm10, %v1027_v23, %v1023_v25  ;;  %vm944_vm13 = vmor %vm942_vm12, %vm943_vm11 }
 0x3f2   : > { %v939_v27 = vsub.f32 1.0, %v938_v24  ;;  %v1029_v28 = vmul.f32 %v1588_v7, %v1028_v26 }
 0x3f4   : > { %v940_v30 = vmul.f32 %v1594_v22, %v939_v27  ;;  %1482 = vmatmul.msk.f32.vlgmr.msrb.gmra.mxu1 %vm927_vm6, %v1029_v28 }
 0x3f6   : > { %v941_v32 = vadd.f32 %v1594_v22, %v940_v30 }
 0x3f8   : > { %v945_v34 = vsel %vm944_vm13, %v1594_v22, %v941_v32 }
 0x3f9   : > { %v950_v35 = vsel %vm947_vm14, %v949_v33, %v945_v34 }
 0x3fa   : > { %v951_v36 = vmul.f32 %v1590_v11, %v950_v35 }
 0x3fc   : > { %1479 = vmatmul.msk.f32.vlgmr.msrb.gmra.mxu2 %vm927_vm6, %v951_v36 }
 0x471   : > { %v1054_v40 = vpop.f32.mrf.mxu1 }
 0x472   : > { %1058 = vrot.lane.b32.xlu0 %v1054_v40, %s1803_s1  ;;  %s2348_s1 = sld [smem:[#allocation35_spill]] }
 0x478   : > { %v1290_v20 = vld [vmem:[%s2348_s1 + $0x78] sm:$0xff]  ;;  %v1289_v21 = vld [vmem:[%s2348_s1 + $0x70] sm:$0xff]  ;;  %v1288_v22 = vld [vmem:[%s2348_s1 + $0x68] sm:$0xff] }
 0x479   : > { %1295 = vmatpush.msra.mxu3 %v1290_v20  ;;  %v1287_v23 = vld [vmem:[%s2348_s1 + $0x60] sm:$0xff]  ;;  %v1286_v24 = vld [vmem:[%s2348_s1 + $0x58] sm:$0xff]  ;;  %v1285_v25 = vld [vmem:[%s2348_s1 + $0x50] sm:$0xff] }
 0x47a   : > { %v1284_v26 = vld [vmem:[%s2348_s1 + $0x48] sm:$0xff]  ;;  %v1283_v27 = vld [vmem:[%s2348_s1 + $0x40] sm:$0xff]  ;;  %v1282_v28 = vld [vmem:[%s2348_s1 + $0x38] sm:$0xff] }
 0x47b   : > { %1296 = vmatpush.msra.mxu3 %v1289_v21  ;;  %v1281_v29 = vld [vmem:[%s2348_s1 + $0x30] sm:$0xff]  ;;  %v1280_v30 = vld [vmem:[%s2348_s1 + $0x28] sm:$0xff]  ;;  %v1279_v31 = vld [vmem:[%s2348_s1 + $0x20] sm:$0xff] }
 0x47c   : > { %v1278_v32 = vld [vmem:[%s2348_s1 + $0x18] sm:$0xff]  ;;  %v1277_v34 = vld [vmem:[%s2348_s1 + $0x10] sm:$0xff]  ;;  %v1276_v35 = vld [vmem:[%s2348_s1 + $0x8] sm:$0xff] }
 0x47d   : > { %1297 = vmatpush.msra.mxu3 %v1288_v22  ;;  %v1275_v36 = vld [vmem:[%s2348_s1] sm:$0xff] }
 0x47f   : > { %v972_v42 = vpop.f32.mrf.mxu2  ;;  %1298 = vmatpush.msra.mxu3 %v1287_v23 }
 0x481   : > { %1299 = vmatpush.msra.mxu3 %v1286_v24 }
 0x483   : > { %1300 = vmatpush.msra.mxu3 %v1285_v25 }
 0x485   : > { %1301 = vmatpush.msra.mxu3 %v1284_v26 }
 0x487   : > { %1302 = vmatpush.msra.mxu3 %v1283_v27 }
 0x489   : > { %1303 = vmatpush.msra.mxu3 %v1282_v28 }
 0x48b   : > { %1304 = vmatpush.msra.mxu3 %v1281_v29 }
 0x48d   : > { %1305 = vmatpush.msra.mxu3 %v1280_v30 }
 0x48f   : > { %1306 = vmatpush.msra.mxu3 %v1279_v31 }
 0x491   : > { %1307 = vmatpush.msra.mxu3 %v1278_v32 }
 0x493   : > { %1308 = vmatpush.msra.mxu3 %v1277_v34 }
 0x494   : > { %1208 = vxpose.xlu0.b32.start.end [1/1] (short) (narrow) %v769_v62, 8 }
 0x495   : > { %1309 = vmatpush.msra.mxu3 %v1276_v35 }
 0x497   : > { %1310 = vmatpush.msra.mxu3 %v1275_v36 }
 0x4e4   : > { %v1059_v43 = vpop.permute.xlu0 %1058 }
 0x4e5   : > { %v1061_v44 = vsel %vm897_vm5, %v972_v42, %v1059_v43 }
 0x4e6   : > { %1483 = vmatmul.msk.f32.vlgmr.msra.gmra.mxu2 %vm772_vm0, %v1061_v44 }
 0x538   : > { %v1224_v18 = vpop.trf.xlu0 }
 0x569   : > { %v1090_v46 = vpop.f32.mrf.mxu2 }
 0x56a   : > { %v1091_v47 = vadd.f32 %v1577_v45, %v1090_v46  ;;  %v1582_v45 = vld [vmem:[%s2350_s28] ss:$0 sm:$0xff] }
 0x56c   : > { %v2159_v48 = vadd.f32 %v1091_v47, %v2062_v0  ;;  %v1128_v0 = vld [vmem:[#allocation7 + $0x10] sm:$0xff] }
 0x56d   : > { %1150 = vmatpush.msra.mxu1 %v1128_v0 }
 0x56e   : > { %v1096_v49 = vsel %vm772_vm0, %v2159_v48, 0.0 }
 0x56f   : > { %1097 = vadd.xlane.f32.xlu1 %v1096_v49  ;;  %1151 = vmatpush.msra.mxu1 %v1127_v58 }
 0x571   : > { %1152 = vmatpush.msra.mxu1 %v1126_v60 }
 0x5e2   : > { %v1098_v50 = vpop.xlane.xlu1 %1097 }
 0x5e3   : > { %v1099_v51 = vmul.f32 %v1098_v50, %v2066_v8 }
 0x5e5   : > { %v1100_v52 = vsub.f32 %v2159_v48, %v1099_v51 }
 0x5e7   : > { %v1101_v53 = vmul.f32 %v1100_v52, %v1100_v52 }
 0x5e9   : > { %v1102_v54 = vsel %vm772_vm0, %v1101_v53, 0.0 }
 0x5ea   : > { %1103 = vadd.xlane.f32.xlu2 %v1102_v54 }
 0x65d   : > { %v1104_v63 = vpop.xlane.xlu2 %1103 }
 0x65e   : > { %v1105_v1 = vmul.f32 %v1104_v63, %v2066_v8  ;;  %v1579_v8 = vld [vmem:[%s2346_s5] ss:$0 sm:$0xff] }
 0x660   : > { %v1106_v2 = vadd.f32 1e-05, %v1105_v1 }
 0x662   : > { %1595 = vrsqrt.f32 %v1106_v2  ;;  %vm1113_vm1 = vweird.f32 %v1106_v2 }
 0x668   : > { %v1596_v3 = vpop.eup %1595 }
 0x669   : > { %v1108_v4 = vmul.f32 %v1596_v3, %v1106_v2  ;;  %vm1114_vm15 = vweird.f32 %v1596_v3 }
 0x66a   : > { %vm1115_vm2 = vmor %vm1113_vm1, %vm1114_vm15 }
 0x66b   : > { %v1109_v5 = vmul.f32 %v1596_v3, %v1108_v4 }
 0x66d   : > { %v1110_v6 = vmul.f32 0.5, %v1109_v5 }
 0x66f   : > { %v1111_v7 = vsub.f32 1.5, %v1110_v6 }
 0x671   : > { %v1112_v9 = vmul.f32 %v1596_v3, %v1111_v7 }
 0x673   : > { %v1116_v11 = vsel %vm1115_vm2, %v1596_v3, %v1112_v9 }
 0x674   : > { %v1117_v12 = vmul.f32 %v1116_v11, %v1100_v52 }
 0x676   : > { %v1121_v13 = vmul.f32 %v1578_v10, %v1117_v12 }
 0x678   : > { %v1125_v14 = vadd.f32 %v1579_v8, %v1121_v13 }
 0x67a   : > { %1484 = vmatmul.msk.f32.vlgmr.msra.gmra.mxu1 %vm772_vm0, %v1125_v14  ;;  %1485 = vmatmul.msk.f32.vlgmr.msrb.gmra.mxu0 %vm772_vm0, %v1125_v14 }
 0x6f7   : > { %v1182_v16 = vpop.f32.mrf.mxu0  ;;  %v1154_v37 = vpop.f32.mrf.mxu1 }
 0x6f8   : > { %v1183_v17 = vadd.f32 %v1581_v15, %v1182_v16  ;;  %v1155_v40 = vadd.f32 %v1580_v38, %v1154_v37 }
 0x6fa   : > { %1241 = vrot.lane.b32.xlu2 %v1183_v17, %s1804_s26  ;;  %1203 = vmatpush.msrb.mxu1 %v1183_v17 }
 0x6fb   : > { %1486 = vmatmul.msk.f32.vlgmr.msrb.gmra.mxu1 %vm927_vm6, %v769_v62 }
 0x754   : > { %v1242_v19 = vpop.permute.xlu2 %1241 }
 0x755   : > { %1262 = vmatpush.msrb.mxu2 %v1242_v19 }
 0x756   : > { %1487 = vmatmul.msk.f32.vlgmr.msrb.gmra.mxu2 %vm927_vm6, %v1224_v18 }
 0x778   : > { %v1205_v39 = vpop.f32.mrf.mxu1 }
 0x7d9   : > { %v1264_v33 = vpop.f32.mrf.mxu2 }
 0x7da   : > { %1268 = vrot.lane.b32.xlu2 %v1264_v33, %s1804_s26 }
 0x834   : > { %v1269_v41 = vpop.permute.xlu2 %1268 }
 0x835   : > { %v1272_v42 = vsel %vm1271_vm3, %v1205_v39, %v1269_v41 }
 0x836   : > { %v1273_v43 = vadd.f32 %v1272_v42, %v1155_v40 }
 0x838   : > { %v1274_v44 = vmax.f32 %v1273_v43, 0.0 }
 0x83a   : > { %1311 = vmatmul.f32.vlgmr.msra.gmra.mxu3 %v1274_v44 }
 0x8bd   : > { %v1312_v46 = vpop.f32.mrf.mxu3 }
 0x8be   : > { %v1313_v47 = vadd.f32 %v1582_v45, %v1312_v46 }
 0x8c0   : > { %v1315_v49 = vadd.f32 %v1313_v47, %v2159_v48 }
 0x8c2   : > { %1316 = vst.msk [vmem:[%s760_s20] sm:$0xff] %vm772_vm0, %v1315_v49 }
 0x8c3   : > { %1744 = shalt.err (!%p1741_p11)
}
 0x8c4   : > { %1505 = dma.vmem_to_hbm [thread:$0]  (%p1984_p4), %s1331_s13, 128, %s1333_s27, %s1318_s0  }
 0x8c5 PF: > { %s2353_s18 = sld [smem:[#allocation16_spill]] }
 0x8c6   : > { %s2355_s28 = sld [smem:[#allocation18_spill]] }
 0x8cb   : > { %s1344_s30 = sand.u32 1, %s2353_s18  }
 0x8cc   : > { %p2356_p5 = scmp.ge.s32.totalorder %s2355_s28, 2  ;;  %s1345_s4 = scalar_lea.sflag [#allocation4], %s1344_s30 }
 0x8ce   : > { %p1522_p13 = pnand %p2356_p5, %p1988_p6 }
 0x8d0   : > { %p1523_p0 = pneg %p1522_p13 }
 0x8d2   : > { %1778 = dma.done.wait (%p1523_p0), %s1345_s4, 128  }
 0x8d3   : > { %1780 = vsyncadd (%p1523_p0), %s1345_s4, 4294967168  ;;  %s2357_s27 = sld [smem:[#allocation19_spill]]  ;;  %s2360_s2 = smov %s1787_s25 }
 0x8d4   : > { %s2358_s14 = sld [smem:[#allocation17_spill]] }
 0x8d5   : > { %s2359_s26 = sld [smem:[#allocation20_spill]] }
 0x8d9   : > { %p38_p2 = scmp.ge.s32.totalorder %s2357_s27, 4  }
 0x8da   : > { %s2361_s25 = smov %s2358_s14 }
 0x8db   :  { %40 = sbr.rel (!%p38_p2) target bundleno = 24 (0x18), region = 173 }
 0x8e0   :  { %1351 = vsyncpa [#allocation3], 1 }
 0x8e1   :  { %1353 = vsyncpa [#allocation3 + $0x1], 1 }
 0x8e2   :  { %1354 = vsyncpa [#allocation6], 1 }
 0x8e3   :  { %1356 = vsyncpa [#allocation6 + $0x1], 1 }
 0x8e4   :  { %1357 = vsyncpa [#allocation9], 1 }
 0x8e5   :  { %1358 = vsyncpa [#allocation4], 1 }
 0x8e6   :  { %1360 = vsyncpa [#allocation4 + $0x1], 1 }

</bundles_post_ra>
